<compile_context>
chip_gen: v6e
topology: v6e:2x2x1
jax: 0.10.0
libtpu: 0.0.40
codegen_flags: <defaults>
</compile_context>

<pallas_src>
import functools

import jax
import jax.numpy as jnp
from jax.experimental import pallas as pl
from jax.experimental.pallas import tpu as pltpu

# ---------------- synthetic config (module __init__ dims) ----------------
POLICY_STATE_DIM = 32        # policy_state_dim
EMB_NUM_DIMS = 16            # embodiment_encoder.num_dims
HIDDEN = 64                  # policy_model hidden width
H_PAD = 128                  # hidden width zero-padded to a full vreg lane width
COMMAND_N_CHANNELS = 8       # command_n_channels -> 'mean' output width
EMB_RAW_DIM = 8              # embodiment embedding-table width
EMBODIMENT_VOCAB = {"franka": 0, "ur10": 1, "kinova": 2, "jaco": 3}


def _round_up(x, m):
    return (x + m - 1) // m * m


def _pad2(a, rows, cols):
    """Zero-pad a 2-D array up to (rows, cols)."""
    return jnp.zeros((rows, cols), a.dtype).at[: a.shape[0], : a.shape[1]].set(a)


# ------------------------------ kernel -----------------------------------
def _policy_mlp_kernel(x_ref, w1_ref, b1e_ref, w2_ref, b2_ref, wm_ref, bm_ref, out_ref):
    """Fused policy MLP for one batch tile.

    x_ref   : (TB, D)   native-dtype policy-state tile (cast in-kernel)
    w1_ref  : (D, H_PAD)        policy-state half of layer-1 weight (zero-padded cols)
    b1e_ref : (1, H_PAD)  f32   fused bias = enc @ W1[D:] + b1  (concat folded away)
    w2_ref  : (H_PAD, H_PAD)    zero-padded rows/cols
    b2_ref  : (1, H_PAD)  f32
    wm_ref  : (H_PAD, C)        mean head (zero-padded rows)
    bm_ref  : (1, C)      f32
    out_ref : (TB, C)     f32   minimal-width output (full last dim of the out array)
    """
    x = x_ref[...].astype(w1_ref.dtype)                     # in-kernel cast: free VPU op
    h = jnp.dot(x, w1_ref[...], preferred_element_type=jnp.float32)
    h = jnp.maximum(h + b1e_ref[...], 0.0)                  # f32 VPU work, full 128 lanes

    h2 = jnp.dot(h.astype(w2_ref.dtype), w2_ref[...],
                 preferred_element_type=jnp.float32)
    h2 = jnp.maximum(h2 + b2_ref[...], 0.0)

    out_ref[...] = (
        jnp.dot(h2.astype(wm_ref.dtype), wm_ref[...],
                preferred_element_type=jnp.float32)
        + bm_ref[...]
    ).astype(out_ref.dtype)


# ------------------------- parameters / init -----------------------------
def make_params(key):
    """Deterministic synthetic parameters (stand-in for the checkpoint)."""
    ks = jax.random.split(key, 8)
    scale = 0.1
    return {
        # embodiment encoder: embedding table + linear projection
        "emb_table": scale * jax.random.normal(ks[0], (len(EMBODIMENT_VOCAB), EMB_RAW_DIM), jnp.float32),
        "enc_w": scale * jax.random.normal(ks[1], (EMB_RAW_DIM, EMB_NUM_DIMS), jnp.float32),
        "enc_b": scale * jax.random.normal(ks[2], (EMB_NUM_DIMS,), jnp.float32),
        # policy model MLP (in = D + E, split into x-part / enc-part)
        "w1x": scale * jax.random.normal(ks[3], (POLICY_STATE_DIM, HIDDEN), jnp.float32),
        "w1e": scale * jax.random.normal(ks[4], (EMB_NUM_DIMS, HIDDEN), jnp.float32),
        "b1": jnp.zeros((1, HIDDEN), jnp.float32),
        "w2": scale * jax.random.normal(ks[5], (HIDDEN, HIDDEN), jnp.float32),
        "b2": jnp.zeros((1, HIDDEN), jnp.float32),
        "wm": scale * jax.random.normal(ks[6], (HIDDEN, COMMAND_N_CHANNELS), jnp.float32),
        "bm": jnp.zeros((1, COMMAND_N_CHANNELS), jnp.float32),
    }


def prepare_inference_params(params, embodiment_type, compute_dtype=jnp.float32):
    """One-time (per embodiment type) precompute, hoisted out of the forward path.

    Folds the embodiment encoder AND its layer-1 contribution into a constant bias,
    and zero-pads the hidden width 64 -> 128 (exact: ReLU(0)=0 and the padded hidden
    units feed zero rows of the next weight).
    TODO(synk): real embodiment_encoder / policy_model architectures are gin-configured
    and loaded from a torch checkpoint; an embedding-lookup + Linear / 3-layer MLP
    stand-in with synthetic weights is used here.
    """
    idx = EMBODIMENT_VOCAB[embodiment_type]
    raw = params["emb_table"][idx]                                 # (EMB_RAW_DIM,)
    enc = raw @ params["enc_w"] + params["enc_b"]                  # (EMB_NUM_DIMS,)
    enc_bias = enc[None, :] @ params["w1e"] + params["b1"]         # (1, H)

    return {
        "w1": _pad2(params["w1x"], POLICY_STATE_DIM, H_PAD).astype(compute_dtype),
        "enc_bias": _pad2(enc_bias, 1, H_PAD).astype(jnp.float32),
        "w2": _pad2(params["w2"], H_PAD, H_PAD).astype(compute_dtype),
        "b2": _pad2(params["b2"], 1, H_PAD).astype(jnp.float32),
        "wm": _pad2(params["wm"], H_PAD, COMMAND_N_CHANNELS).astype(compute_dtype),
        "bm": params["bm"].astype(jnp.float32),
    }


# ------------------------------ forward ----------------------------------
@functools.partial(jax.jit, static_argnames=("tb",))
def es_distillation_policy_wrapper_forward(policy_state, prep, *, tb=4096):
    """JAX/Pallas equivalent of ESDistillationPolicyWrapper.forward -> 'mean' (B, C)."""
    B, D = policy_state.shape
    compute_dtype = jnp.dtype(prep["w1"].dtype)

    # Sublane pack of the compute dtype: 8 (f32) / 16 (bf16) / 32 (int8/fp8).
    sub = {1: 32, 2: 16}.get(compute_dtype.itemsize, 8)

    # Batch tile: big enough to amortize the ~0.35 us per-grid-step overhead, rounded
    # to the sublane pack, and never larger than B once B >= sub (partial edge tiles
    # are handled by the Pallas pipeline: OOB reads stay in their own rows, OOB writes
    # are dropped, so no wrapper-side pad/slice HBM passes are needed).
    tb_eff = max(sub, _round_up(tb, sub))
    TB = min(tb_eff, max(sub, (B // sub) * sub))
    grid = (pl.cdiv(B, TB),)

    flops = 2 * B * (D * H_PAD + H_PAD * H_PAD + H_PAD * COMMAND_N_CHANNELS)
    weight_bytes = sum(int(v.size) * jnp.dtype(v.dtype).itemsize for v in prep.values())
    bytes_accessed = int(
        B * (D * jnp.dtype(policy_state.dtype).itemsize + COMMAND_N_CHANNELS * 4)
        + weight_bytes
    )

    out = pl.pallas_call(
        _policy_mlp_kernel,
        out_shape=jax.ShapeDtypeStruct((B, COMMAND_N_CHANNELS), jnp.float32),
        grid_spec=pltpu.PrefetchScalarGridSpec(
            num_scalar_prefetch=0,
            grid=grid,
            in_specs=[
                pl.BlockSpec((TB, D), lambda i: (i, 0)),                     # activations: tiled
                pl.BlockSpec((D, H_PAD), lambda i: (0, 0)),                  # weights: VMEM-resident
                pl.BlockSpec((1, H_PAD), lambda i: (0, 0)),                  # (constant index_map;
                pl.BlockSpec((H_PAD, H_PAD), lambda i: (0, 0)),              #  Mosaic re-uses the
                pl.BlockSpec((1, H_PAD), lambda i: (0, 0)),                  #  same block across
                pl.BlockSpec((H_PAD, COMMAND_N_CHANNELS), lambda i: (0, 0)), #  grid steps)
                pl.BlockSpec((1, COMMAND_N_CHANNELS), lambda i: (0, 0)),
            ],
            # Minimal-HBM output: (TB, C) with C equal to the full last dim (32 B/row).
            out_specs=pl.BlockSpec((TB, COMMAND_N_CHANNELS), lambda i: (i, 0)),
        ),
        compiler_params=pltpu.CompilerParams(
            dimension_semantics=("parallel",)),     # shards batch steps across v7x's 2 TCs
        cost_estimate=pl.CostEstimate(
            flops=flops, transcendentals=0, bytes_accessed=bytes_accessed),
    )(policy_state, prep["w1"], prep["enc_bias"], prep["w2"], prep["b2"],
      prep["wm"], prep["bm"])

    return out


# ---------------------------- pure-JAX reference --------------------------
def _reference_forward(policy_state, params, embodiment_type):
    """Mirrors the PyTorch graph exactly (unsqueeze/repeat/stack/cat/pack)."""
    B = policy_state.shape[0]
    emb_idx = EMBODIMENT_VOCAB[embodiment_type]
    enc = params["emb_table"][emb_idx] @ params["enc_w"] + params["enc_b"]   # (E,)
    ps = policy_state[:, None, :]                                            # (B,1,D)
    enc_rep = jnp.broadcast_to(enc[None, None, :], (B, 1, EMB_NUM_DIMS))     # (B,1,E)
    x = jnp.concatenate([ps, enc_rep], axis=-1).reshape(B, -1)               # (B, D+E)
    w1 = jnp.concatenate([params["w1x"], params["w1e"]], axis=0)
    h = jnp.maximum(x @ w1 + params["b1"], 0.0)
    h2 = jnp.maximum(h @ params["w2"] + params["b2"], 0.0)
    return h2 @ params["wm"] + params["bm"]


if __name__ == "__main__":
    key = jax.random.PRNGKey(0)
    k_params, k_x1, k_x2 = jax.random.split(key, 3)
    params = make_params(k_params)

    # --- f32 path: B=10, tb=8 -> TB=8, 2-step grid with a partial edge tile ---
    prep_f32 = prepare_inference_params(params, "franka", jnp.float32)
    x1 = jax.random.normal(k_x1, (10, POLICY_STATE_DIM), jnp.float32)
    mean_f32 = jax.block_until_ready(
        es_distillation_policy_wrapper_forward(x1, prep_f32, tb=8))
    ref_f32 = _reference_forward(x1, params, "franka")
    assert mean_f32.shape == (10, COMMAND_N_CHANNELS)
    assert jnp.allclose(mean_f32, ref_f32, atol=2e-5, rtol=2e-5)

    # --- f32 path, default tb (single grid step for small B) ---
    mean_def = jax.block_until_ready(
        es_distillation_policy_wrapper_forward(x1, prep_f32))
    assert mean_def.shape == (10, COMMAND_N_CHANNELS)
    assert jnp.allclose(mean_def, ref_f32, atol=2e-5, rtol=2e-5)

    # --- bf16-operand path (f32 accumulation): B=24 -> TB=16, 2-step grid ---
    prep_bf16 = prepare_inference_params(params, "ur10", jnp.bfloat16)
    x2 = jax.random.normal(k_x2, (24, POLICY_STATE_DIM), jnp.float32)
    mean_bf16 = jax.block_until_ready(
        es_distillation_policy_wrapper_forward(x2, prep_bf16, tb=8))
    ref_bf16 = _reference_forward(x2, params, "ur10")
    assert mean_bf16.shape == (24, COMMAND_N_CHANNELS)
    assert jnp.allclose(mean_bf16, ref_bf16, atol=3e-2, rtol=3e-2)

    print("KERNEL_OK")
</pallas_src>

<mosaic_0001>
module attributes {stable_mosaic.version = 11 : i64} {
  func.func @_policy_mlp_kernel(%arg0: i32, %arg1: memref<8x32xf32, #tpu.memory_space<vmem>>, %arg2: memref<32x128xf32, #tpu.memory_space<vmem>>, %arg3: memref<1x128xf32, #tpu.memory_space<vmem>>, %arg4: memref<128x128xf32, #tpu.memory_space<vmem>>, %arg5: memref<1x128xf32, #tpu.memory_space<vmem>>, %arg6: memref<128x8xf32, #tpu.memory_space<vmem>>, %arg7: memref<1x8xf32, #tpu.memory_space<vmem>>, %arg8: memref<8x8xf32, #tpu.memory_space<vmem>>) attributes {dimension_semantics = [#tpu.dimension_semantics<parallel>], iteration_bounds = array<i64: 2>, scalar_prefetch = 0 : i64, scratch_operands = 0 : i64, tpu.core_type = #tpu.core_type<tc>, window_params = [{transform_indices = @transform_0, window_bounds = array<i64: 8, 32>}, {pipeline_mode = #tpu.pipeline_mode<synchronous>, transform_indices = @transform_1, window_bounds = array<i64: 32, 128>}, {pipeline_mode = #tpu.pipeline_mode<synchronous>, transform_indices = @transform_2, window_bounds = array<i64: 1, 128>}, {pipeline_mode = #tpu.pipeline_mode<synchronous>, transform_indices = @transform_3, window_bounds = array<i64: 128, 128>}, {pipeline_mode = #tpu.pipeline_mode<synchronous>, transform_indices = @transform_4, window_bounds = array<i64: 1, 128>}, {pipeline_mode = #tpu.pipeline_mode<synchronous>, transform_indices = @transform_5, window_bounds = array<i64: 128, 8>}, {pipeline_mode = #tpu.pipeline_mode<synchronous>, transform_indices = @transform_6, window_bounds = array<i64: 1, 8>}, {transform_indices = @transform_7, window_bounds = array<i64: 8, 8>}]} {
    %c0 = arith.constant 0 : index
    %c0_0 = arith.constant 0 : index
    %0 = vector.load %arg1[%c0, %c0_0] : memref<8x32xf32, #tpu.memory_space<vmem>>, vector<8x32xf32>
    %c0_1 = arith.constant 0 : index
    %c0_2 = arith.constant 0 : index
    %1 = vector.load %arg2[%c0_1, %c0_2] : memref<32x128xf32, #tpu.memory_space<vmem>>, vector<32x128xf32>
    %cst = arith.constant dense<0.000000e+00> : vector<8x128xf32>
    %2 = tpu.matmul %0, %1, %cst {dimension_numbers = #tpu.dot_dimension_numbers<[1], [0], [0], [1], [0, 0, 1, 1], [], []>} : vector<8x32xf32>, vector<32x128xf32>, vector<8x128xf32> -> vector<8x128xf32>
    %c0_3 = arith.constant 0 : index
    %c0_4 = arith.constant 0 : index
    %3 = vector.load %arg3[%c0_3, %c0_4] : memref<1x128xf32, #tpu.memory_space<vmem>>, vector<1x128xf32>
    %4 = vector.broadcast %3 : vector<1x128xf32> to vector<8x128xf32>
    %5 = arith.addf %2, %4 : vector<8x128xf32>
    %cst_5 = arith.constant 0.000000e+00 : f32
    %6 = vector.broadcast %cst_5 : f32 to vector<8x128xf32>
    %7 = arith.maximumf %5, %6 : vector<8x128xf32>
    %c0_6 = arith.constant 0 : index
    %c0_7 = arith.constant 0 : index
    %8 = vector.load %arg4[%c0_6, %c0_7] : memref<128x128xf32, #tpu.memory_space<vmem>>, vector<128x128xf32>
    %cst_8 = arith.constant dense<0.000000e+00> : vector<8x128xf32>
    %9 = tpu.matmul %7, %8, %cst_8 {dimension_numbers = #tpu.dot_dimension_numbers<[1], [0], [0], [1], [0, 0, 1, 1], [], []>} : vector<8x128xf32>, vector<128x128xf32>, vector<8x128xf32> -> vector<8x128xf32>
    %c0_9 = arith.constant 0 : index
    %c0_10 = arith.constant 0 : index
    %10 = vector.load %arg5[%c0_9, %c0_10] : memref<1x128xf32, #tpu.memory_space<vmem>>, vector<1x128xf32>
    %11 = vector.broadcast %10 : vector<1x128xf32> to vector<8x128xf32>
    %12 = arith.addf %9, %11 : vector<8x128xf32>
    %cst_11 = arith.constant 0.000000e+00 : f32
    %13 = vector.broadcast %cst_11 : f32 to vector<8x128xf32>
    %14 = arith.maximumf %12, %13 : vector<8x128xf32>
    %c0_12 = arith.constant 0 : index
    %c0_13 = arith.constant 0 : index
    %15 = vector.load %arg6[%c0_12, %c0_13] : memref<128x8xf32, #tpu.memory_space<vmem>>, vector<128x8xf32>
    %cst_14 = arith.constant dense<0.000000e+00> : vector<8x8xf32>
    %16 = tpu.matmul %14, %15, %cst_14 {dimension_numbers = #tpu.dot_dimension_numbers<[1], [0], [0], [1], [0, 0, 1, 1], [], []>} : vector<8x128xf32>, vector<128x8xf32>, vector<8x8xf32> -> vector<8x8xf32>
    %c0_15 = arith.constant 0 : index
    %c0_16 = arith.constant 0 : index
    %17 = vector.load %arg7[%c0_15, %c0_16] : memref<1x8xf32, #tpu.memory_space<vmem>>, vector<1x8xf32>
    %18 = vector.broadcast %17 : vector<1x8xf32> to vector<8x8xf32>
    %19 = arith.addf %16, %18 : vector<8x8xf32>
    %c0_17 = arith.constant 0 : index
    %c0_18 = arith.constant 0 : index
    %20 = vector.load %arg8[%c0_17, %c0_18] : memref<8x8xf32, #tpu.memory_space<vmem>>, vector<8x8xf32>
    tpu.vector_store %arg8[%c0_17, %c0_18], %19 {strides = array<i32>} : memref<8x8xf32, #tpu.memory_space<vmem>>, vector<8x8xf32>,
    return
  }
  func.func @transform_0(%arg0: i32) -> (i32, i32) {
    %c0_i32 = arith.constant 0 : i32
    %c0_i32_0 = arith.constant 0 : i32
    return %arg0, %c0_i32 : i32, i32
  }
  func.func @transform_1(%arg0: i32) -> (i32, i32) {
    %c0_i32 = arith.constant 0 : i32
    %c0_i32_0 = arith.constant 0 : i32
    %c0_i32_1 = arith.constant 0 : i32
    return %c0_i32, %c0_i32_0 : i32, i32
  }
  func.func @transform_2(%arg0: i32) -> (i32, i32) {
    %c0_i32 = arith.constant 0 : i32
    %c0_i32_0 = arith.constant 0 : i32
    %c0_i32_1 = arith.constant 0 : i32
    return %c0_i32, %c0_i32_0 : i32, i32
  }
  func.func @transform_3(%arg0: i32) -> (i32, i32) {
    %c0_i32 = arith.constant 0 : i32
    %c0_i32_0 = arith.constant 0 : i32
    %c0_i32_1 = arith.constant 0 : i32
    return %c0_i32, %c0_i32_0 : i32, i32
  }
  func.func @transform_4(%arg0: i32) -> (i32, i32) {
    %c0_i32 = arith.constant 0 : i32
    %c0_i32_0 = arith.constant 0 : i32
    %c0_i32_1 = arith.constant 0 : i32
    return %c0_i32, %c0_i32_0 : i32, i32
  }
  func.func @transform_5(%arg0: i32) -> (i32, i32) {
    %c0_i32 = arith.constant 0 : i32
    %c0_i32_0 = arith.constant 0 : i32
    %c0_i32_1 = arith.constant 0 : i32
    return %c0_i32, %c0_i32_0 : i32, i32
  }
  func.func @transform_6(%arg0: i32) -> (i32, i32) {
    %c0_i32 = arith.constant 0 : i32
    %c0_i32_0 = arith.constant 0 : i32
    %c0_i32_1 = arith.constant 0 : i32
    return %c0_i32, %c0_i32_0 : i32, i32
  }
  func.func @transform_7(%arg0: i32) -> (i32, i32) {
    %c0_i32 = arith.constant 0 : i32
    %c0_i32_0 = arith.constant 0 : i32
    return %arg0, %c0_i32 : i32, i32
  }
}

</mosaic_0001>

<bundles_post_ra>
// kernel: es_distillation_policy_wrapper_forward.1
= control target key start
LH: loop header
LB: loop body
LE: loop exit
PB: predicated region body
PF: predicated region fallthrough
CT: control target
= control target key end

     0   :  { %12 = vsyncpa [#allocation3], 0  ;;  %s1223_s0 = inlined_call_operand.vmem [shape: f32[10,32], index: 0, kind: input, shape index: {}]   ;;  %s1224_s1 = inlined_call_operand.hbm [shape: f32[32,128], index: 1, kind: input, shape index: {}]   ;;  %s1225_s2 = inlined_call_operand.vmem [shape: f32[1,128], index: 2, kind: input, shape index: {}]   ;;  %s1226_s3 = inlined_call_operand.vmem [shape: f32[128,128], index: 3, kind: input, shape index: {}]   ;;  %s1227_s4 = inlined_call_operand.hbm [shape: f32[1,128], index: 4, kind: input, shape index: {}]   ;;  %s1228_s5 = inlined_call_operand.vmem [shape: f32[128,8], index: 5, kind: input, shape index: {}]   ;;  %s1229_s6 = inlined_call_operand.hbm [shape: f32[1,8], index: 6, kind: input, shape index: {}]   ;;  %s1230_s7 = inlined_call_operand.vmem [shape: f32[10,8], index: 7, kind: output, shape index: {}]  }
   0x1   :  { %13 = vsyncpa [#allocation5], 0  ;;  %s997_s24 = smov 0  }
   0x2 LB: > { %s950_s25 = smov [#allocation4]   ;;  %s1003_s27 = sadd.s32 4294967295, %s948_s24   ;;  %s948_s24 = sphi %s997_s24, %s19_s24  }
   0x3   : > { %s234_s26 = sshll.u32 %s950_s25, 4  ;;  %p676_p0 = scmp.ge.s32.totalorder %s948_s24, 1  ;;  %s235_s26 = int_to_ptr.vmem [resolvable:$true] %s234_s26 }
   0x4   : > { %p202_p1 = scmp.lt.s32.totalorder %s948_s24, 3  ;;  %p1231_p2 = scmp.eq.s32.totalorder %s1003_s27, 0 }
   0x5   : > { %s951_s29 = smov [#allocation2]   ;;  %s952_s9 = smov [#allocation6]  }
   0x6   : > { %p1008_p3 = pnand %p676_p0, %p202_p1  ;;  %s214_s30 = sshll.u32 %s951_s29, 4  ;;  %s215_s30 = int_to_ptr.vmem [resolvable:$true] %s214_s30 }
   0x7   : > { %s248_s10 = sshll.u32 %s952_s9, 4  ;;  %s867_s11 = scalar_lea.vmem %s235_s26, 16  ;;  %s1020_s10 = int_to_ptr.vmem [resolvable:$true] %s248_s10 }
   0x8   : > { %s1233_s28 = scalar_select %p1008_p3, 1, 0 }
   0x9   : > { %p825_p4 = pneg %p1008_p3  ;;  %p868_p7 = scmp.ne.s32.totalorder %s235_s26, %s867_s11 }
   0xa   : > { %s874_s12 = scalar_lea.vmem %s235_s26, 32  ;;  %p875_p10 = scmp.lt.s32.totalorder %s235_s26, %s235_s26 }
   0xb   : > { %p1016_p5 = pnand %p1231_p2, %p825_p4  ;;  %p876_p11 = scmp.lt.s32.totalorder %s874_s12, %s867_s11 }
   0xd   : > { %p858_p6 = pneg %p1016_p5  ;;  %p877_p12 = por %p876_p11, %p875_p10 }
   0xf   : > { %p870_p8 = pnand %p868_p7, %p858_p6 }
  0x11   : > { %p871_p9 = pneg %p870_p8 }
  0x13   : > { %p878_p13 = pnand %p877_p12, %p871_p9 }
  0x15   : > { %881 = shalt.err (!%p878_p13)
}
  0x16   : > { %831 = dma.hbm_to_vmem [thread:$0]  (!%p1016_p5), %s1227_s4, 16, %s235_s26, [#allocation5]  }
  0x17   : > { %s893_s15 = scalar_lea.vmem %s215_s30, 512  ;;  %p901_p7 = scmp.lt.s32.totalorder %s215_s30, %s215_s30 }
  0x18   : > { %p894_p0 = scmp.ne.s32.totalorder %s215_s30, %s893_s15  ;;  %p902_p8 = scmp.lt.s32.totalorder %s893_s15, %s893_s15 }
  0x1a   : > { %p896_p1 = pnand %p894_p0, %p858_p6  ;;  %p903_p2 = por %p902_p8, %p901_p7 }
  0x1c   : > { %p897_p4 = pneg %p896_p1 }
  0x1e   : > { %p904_p3 = pnand %p903_p2, %p897_p4 }
  0x20   : > { %907 = shalt.err (!%p904_p3)
}
  0x21   : > { %s953_s16 = smov 128   ;;  %s954_s17 = smov 8  }
  0x22   : > { %828 = dma.hbm_to_vmem [thread:$0]  (!%p1016_p5), %s1224_s1, 512, %s215_s30, [#allocation3], %s953_s16, %s953_s16, %s954_s17  }
  0x23   : > { %s919_s20 = scalar_lea.vmem %s1020_s10, 16  ;;  %s926_s21 = scalar_lea.vmem %s1020_s10, 32 }
  0x24   : > { %p920_p9 = scmp.ne.s32.totalorder %s1020_s10, %s919_s20  ;;  %p927_p3 = scmp.lt.s32.totalorder %s1020_s10, %s1020_s10 }
  0x25   : > { %p928_p11 = scmp.lt.s32.totalorder %s926_s21, %s919_s20 }
  0x26   : > { %p922_p10 = pnand %p920_p9, %p858_p6 }
  0x27   : > { %p929_p12 = por %p928_p11, %p927_p3 }
  0x28   : > { %p923_p2 = pneg %p922_p10 }
  0x2a   : > { %p930_p13 = pnand %p929_p12, %p923_p2 }
  0x2c   : > { %933 = shalt.err (!%p930_p13)
}
  0x2d   : > { %834 = dma.hbm_to_vmem [thread:$0]  (!%p1016_p5), %s1229_s6, 16, %s1020_s10, [#allocation5]  }
  0x2e   : > { %p1235_p0 = scmp.ne.s32.totalorder %s1233_s28, 0 }
  0x2f   : > { %p1236_p6 = scmp.eq.s32.totalorder (!%p1235_p0), %s1003_s27, 0 }
  0x30   : > { %268 = sbr.rel (%p1235_p0) target bundleno = 658 (0x292), region = 48 }
  0x35   : > { %939 = dma.done.wait (%p1236_p6), [#allocation3], 512   ;;  %p1237_p1 = pmov %p1236_p6 }
  0x37   : > { %941 = vsyncadd (%p1237_p1), [#allocation3], 4294966784  ;;  %p1238_p4 = pmov %p1237_p1 }
  0x38   : > { %p1239_p7 = pmov %p1237_p1 }
  0x39   : > { %943 = dma.done.wait (%p1238_p4), [#allocation5], 32  }
  0x3a   : > { %945 = vsyncadd (%p1239_p7), [#allocation5], 4294967264  ;;  %p306_p8 = scmp.lt.s32.totalorder %s1003_s27, 1  ;;  %v955_v0 = vmov 0.0   ;;  %vm956_vm0 = vmmov 0   ;;  %v318_v1 = vld [vmem:[#allocation2 + $0x18] sm:$0xff] }
  0x3b   : > { %732 = vmatprep.subr.mxu0 %v955_v0  ;;  %740 = vmatprep.mubr.msk.f32.mxu0 %vm956_vm0, %v955_v0  ;;  %v317_v2 = vld [vmem:[#allocation2 + $0x10] sm:$0xff]  ;;  %v416_v3 = vld [vmem:[%s1226_s3 + $0x78] sm:$0xff]  ;;  %v316_v4 = vld [vmem:[#allocation2 + $0x8] sm:$0xff]  ;;  %vm326_vm1 = vcmask 261120   ;;  %vm588_vm2 = vcmask 64512  }
  0x3c   : > { %s1241_s27 = smov (!%p306_p8, %s1003_s27), 1  ;;  %743 = vmatprep.subr.mxu1 %v955_v0  ;;  %775 = vmatprep.mubr.msk.f32.mxu1 %vm956_vm0, %v955_v0  ;;  %v415_v5 = vld [vmem:[%s1226_s3 + $0x70] sm:$0xff]  ;;  %v414_v6 = vld [vmem:[%s1226_s3 + $0x68] sm:$0xff]  ;;  %v315_v7 = vld [vmem:[#allocation2] sm:$0xff] }
  0x3d   : > { %s685_s25 = sshll.u32 %s1241_s27, 3  ;;  %733 = vmatpush3.msra.mxu0 %v318_v1  ;;  %744 = vmatpush3.msra.mxu1 %v416_v3  ;;  %v413_v9 = vld [vmem:[%s1226_s3 + $0x60] sm:$0xff]  ;;  %v412_v10 = vld [vmem:[%s1226_s3 + $0x58] sm:$0xff]  ;;  %v411_v11 = vld [vmem:[%s1226_s3 + $0x50] sm:$0xff] }
  0x3e   : > { %734 = vmatprep.subr.mxu0 %v955_v0  ;;  %s309_s8 = scalar_lea.vmem %s1223_s0, %s685_s25  ;;  %745 = vmatprep.subr.mxu1 %v955_v0  ;;  %v410_v12 = vld [vmem:[%s1226_s3 + $0x48] sm:$0xff]  ;;  %v409_v13 = vld [vmem:[%s1226_s3 + $0x40] sm:$0xff]  ;;  %v408_v14 = vld [vmem:[%s1226_s3 + $0x38] sm:$0xff]  ;;  %s313_s15 = scalar_lea.vmem %s1230_s7, %s685_s25 }
  0x3f   : > { %735 = vmatpush3.msra.mxu0 %v317_v2  ;;  %746 = vmatpush3.msra.mxu1 %v415_v5  ;;  %v314_v8 = vld [vmem:[%s309_s8] sm:$0xff]  ;;  %v407_v15 = vld [vmem:[%s1226_s3 + $0x30] sm:$0xff]  ;;  %v406_v16 = vld [vmem:[%s1226_s3 + $0x28] sm:$0xff] }
  0x40   : > { %736 = vmatprep.subr.mxu0 %v955_v0  ;;  %747 = vmatprep.subr.mxu1 %v955_v0  ;;  %v405_v17 = vld [vmem:[%s1226_s3 + $0x20] sm:$0xff]  ;;  %v404_v18 = vld [vmem:[%s1226_s3 + $0x18] sm:$0xff]  ;;  %v403_v19 = vld [vmem:[%s1226_s3 + $0x10] sm:$0xff] }
  0x41   : > { %737 = vmatpush3.msra.mxu0 %v316_v4  ;;  %748 = vmatpush3.msra.mxu1 %v414_v6  ;;  %v402_v20 = vld [vmem:[%s1226_s3 + $0x8] sm:$0xff]  ;;  %v401_v21 = vld [vmem:[%s1226_s3] sm:$0xff]  ;;  %v510_v22 = vld [vmem:[%s1228_s5 + $0x78] sm:$0xff] }
  0x42   : > { %738 = vmatprep.subr.mxu0 %v955_v0  ;;  %749 = vmatprep.subr.mxu1 %v955_v0  ;;  %v509_v23 = vld [vmem:[%s1228_s5 + $0x70] sm:$0xff]  ;;  %v508_v24 = vld [vmem:[%s1228_s5 + $0x68] sm:$0xff]  ;;  %v507_v25 = vld [vmem:[%s1228_s5 + $0x60] sm:$0xff] }
  0x43   : > { %739 = vmatpush3.msra.mxu0 %v315_v7  ;;  %750 = vmatpush3.msra.mxu1 %v413_v9  ;;  %v506_v26 = vld [vmem:[%s1228_s5 + $0x58] sm:$0xff]  ;;  %v505_v27 = vld [vmem:[%s1228_s5 + $0x50] sm:$0xff]  ;;  %v504_v28 = vld [vmem:[%s1228_s5 + $0x48] sm:$0xff] }
  0x44   : > { %741 = vmatmul.mubr.msk.f32.vlgmr.msra.gmra.mxu0 %vm326_vm1, %v314_v8  ;;  %751 = vmatprep.subr.mxu1 %v955_v0  ;;  %v503_v29 = vld [vmem:[%s1228_s5 + $0x40] sm:$0xff]  ;;  %v502_v30 = vld [vmem:[%s1228_s5 + $0x38] sm:$0xff]  ;;  %v501_v31 = vld [vmem:[%s1228_s5 + $0x30] sm:$0xff] }
  0x45   : > { %778 = vmatprep.subr.mxu0 %v955_v0  ;;  %752 = vmatpush3.msra.mxu1 %v412_v10  ;;  %v500_v32 = vld [vmem:[%s1228_s5 + $0x28] sm:$0xff]  ;;  %v499_v33 = vld [vmem:[%s1228_s5 + $0x20] sm:$0xff]  ;;  %v498_v34 = vld [vmem:[%s1228_s5 + $0x18] sm:$0xff] }
  0x46   : > { %810 = vmatprep.mubr.msk.f32.mxu0 %vm956_vm0, %v955_v0  ;;  %753 = vmatprep.subr.mxu1 %v955_v0  ;;  %v687_v35 = vld [vmem:[%s1225_s2] ss:$0 sm:$0xff]  ;;  %v497_v40 = vld [vmem:[%s1228_s5 + $0x10] sm:$0xff]  ;;  %v496_v41 = vld [vmem:[%s1228_s5 + $0x8] sm:$0xff] }
  0x47   : > { %754 = vmatpush3.msra.mxu1 %v411_v11  ;;  %779 = vmatpush3.msra.mxu0 %v510_v22  ;;  %v495_v42 = vld [vmem:[%s1228_s5] sm:$0xff] }
  0x48   : > { %755 = vmatprep.subr.mxu1 %v955_v0  ;;  %780 = vmatprep.subr.mxu0 %v955_v0  ;;  %v689_v43 = vld [vmem:[#allocation4] ss:$0 sm:$0xff]  ;;  %v690_v48 = vld [vmem:[#allocation6] ss:$0 sm:$0xff] }
  0x49   : > { %756 = vmatpush3.msra.mxu1 %v410_v12  ;;  %781 = vmatpush3.msra.mxu0 %v509_v23 }
  0x4a   : > { %757 = vmatprep.subr.mxu1 %v955_v0  ;;  %782 = vmatprep.subr.mxu0 %v955_v0 }
  0x4b   : > { %758 = vmatpush3.msra.mxu1 %v409_v13  ;;  %783 = vmatpush3.msra.mxu0 %v508_v24 }
  0x4c   : > { %759 = vmatprep.subr.mxu1 %v955_v0  ;;  %784 = vmatprep.subr.mxu0 %v955_v0 }
  0x4d   : > { %760 = vmatpush3.msra.mxu1 %v408_v14  ;;  %785 = vmatpush3.msra.mxu0 %v507_v25 }
  0x4e   : > { %761 = vmatprep.subr.mxu1 %v955_v0  ;;  %786 = vmatprep.subr.mxu0 %v955_v0 }
  0x4f   : > { %762 = vmatpush3.msra.mxu1 %v407_v15  ;;  %787 = vmatpush3.msra.mxu0 %v506_v26 }
  0x50   : > { %763 = vmatprep.subr.mxu1 %v955_v0  ;;  %788 = vmatprep.subr.mxu0 %v955_v0 }
  0x51   : > { %764 = vmatpush3.msra.mxu1 %v406_v16  ;;  %789 = vmatpush3.msra.mxu0 %v505_v27 }
  0x52   : > { %765 = vmatprep.subr.mxu1 %v955_v0  ;;  %790 = vmatprep.subr.mxu0 %v955_v0 }
  0x53   : > { %766 = vmatpush3.msra.mxu1 %v405_v17  ;;  %791 = vmatpush3.msra.mxu0 %v504_v28 }
  0x54   : > { %767 = vmatprep.subr.mxu1 %v955_v0  ;;  %792 = vmatprep.subr.mxu0 %v955_v0 }
  0x55   : > { %768 = vmatpush3.msra.mxu1 %v404_v18  ;;  %793 = vmatpush3.msra.mxu0 %v503_v29 }
  0x56   : > { %769 = vmatprep.subr.mxu1 %v955_v0  ;;  %794 = vmatprep.subr.mxu0 %v955_v0 }
  0x57   : > { %770 = vmatpush3.msra.mxu1 %v403_v19  ;;  %795 = vmatpush3.msra.mxu0 %v502_v30 }
  0x58   : > { %771 = vmatprep.subr.mxu1 %v955_v0  ;;  %796 = vmatprep.subr.mxu0 %v955_v0 }
  0x59   : > { %772 = vmatpush3.msra.mxu1 %v402_v20  ;;  %797 = vmatpush3.msra.mxu0 %v501_v31 }
  0x5a   : > { %773 = vmatprep.subr.mxu1 %v955_v0  ;;  %798 = vmatprep.subr.mxu0 %v955_v0 }
  0x5b   : > { %774 = vmatpush3.msra.mxu1 %v401_v21  ;;  %799 = vmatpush3.msra.mxu0 %v500_v32 }
  0x5c   : > { %800 = vmatprep.subr.mxu0 %v955_v0 }
  0x5d   : > { %801 = vmatpush3.msra.mxu0 %v499_v33 }
  0x5e   : > { %802 = vmatprep.subr.mxu0 %v955_v0 }
  0x5f   : > { %803 = vmatpush3.msra.mxu0 %v498_v34 }
  0x60   : > { %804 = vmatprep.subr.mxu0 %v955_v0 }
  0x61   : > { %805 = vmatpush3.msra.mxu0 %v497_v40 }
  0x62   : > { %806 = vmatprep.subr.mxu0 %v955_v0 }
  0x63   : > { %807 = vmatpush3.msra.mxu0 %v496_v41 }
  0x64   : > { %808 = vmatprep.subr.mxu0 %v955_v0 }
  0x65   : > { %809 = vmatpush3.msra.mxu0 %v495_v42 }
 0x104   : > { %v396_v36 = vpop.f32.mrf.mxu0 }
 0x105   : > { %v397_v37 = vadd.f32 %v687_v35, %v396_v36 }
 0x106   : > { %v742_v38 = vpop.f32.mrf.mxu0 }
 0x107   : > { %v400_v39 = vmax.f32 %v397_v37, 0.0 }
 0x109   : > { %776 = vmatmul.mubr.f32.vlgmr.msra.gmra.mxu1 %v400_v39 }
 0x1c9   : > { %v490_v44 = vpop.f32.mrf.mxu1 }
 0x1ca   : > { %v491_v45 = vadd.f32 %v689_v43, %v490_v44 }
 0x1cb   : > { %v777_v46 = vpop.f32.mrf.mxu1 }
 0x1cc   : > { %v494_v47 = vmax.f32 %v491_v45, 0.0 }
 0x1ce   : > { %811 = vmatmul.mubr.f32.vlgmr.msra.gmra.mxu0 %v494_v47 }
 0x28e   : > { %v584_v49 = vpop.f32.mrf.mxu0 }
 0x28f   : > { %v585_v50 = vadd.f32 %v690_v48, %v584_v49 }
 0x290   : > { %v812_v51 = vpop.f32.mrf.mxu0 }
 0x291   : > { %589 = vst.msk [vmem:[%s313_s15] sm:$0xff] %vm588_vm2, %v585_v50 }
 0x292 PF: > { %s19_s24 = sadd.s32 1, %s948_s24  }
 0x293   : > { %p16_p5 = scmp.ge.s32.totalorder %s19_s24, 4  }
 0x295   :  { %18 = sbr.rel (!%p16_p5) target bundleno = 2 (0x2), region = 91 }
 0x29a   :  { %609 = vsyncpa [#allocation3], 1 }
 0x29b   :  { %611 = vsyncpa [#allocation3 + $0x1], 1 }
 0x29c   :  { %612 = vsyncpa [#allocation5], 1 }

</bundles_post_ra>
